<compile_context>
chip_gen: v6e
topology: v6e:2x2x1
jax: 0.10.0
libtpu: 0.0.40
codegen_flags: <defaults>
</compile_context>

<pallas_src>
import functools

import jax
import jax.numpy as jnp
from jax.experimental import pallas as pl
from jax.experimental.pallas import tpu as pltpu


# ------------------------------ hw / tiling config ---------------------------

def _round_up(x, m):
    return ((x + m - 1) // m) * m


def _hw_config():
    """(tile_byte_budget, vmem_limit_bytes, max_rows_per_tile, assume_two_tensorcores)."""
    cap = None
    try:
        info = pltpu.get_tpu_info()
        for name in ("vmem_capacity_bytes", "vmem_size_bytes", "vmem_bytes"):
            cap = getattr(info, name, None)
            if cap:
                break
    except Exception:
        cap = None
    if cap is not None and int(cap) >= 100 * 1024 * 1024:
        # v5e / v6e: 128 MiB VMEM, single TensorCore.
        return 8 * 1024 * 1024, 48 * 1024 * 1024, 512, False
    # v7x (64 MiB VMEM per TC, 2 TCs) or unknown: conservative footprint.
    return 4 * 1024 * 1024, 40 * 1024 * 1024, 256, True


_TILE_BYTES, _VMEM_LIMIT, _MAX_TO, _ASSUME_TWO_TC = _hw_config()


def _sublane_pack(dtype):
    # minimum sublane multiple so blocks stay native packed tiles
    return {4: 8, 2: 16, 1: 32}.get(jnp.dtype(dtype).itemsize, 8)


def _tiles(O, R, dtype):
    """Pick (TO, TR) tile sizes for a (O, R) array within the per-tile byte budget."""
    pack = _sublane_pack(dtype)
    itemsize = jnp.dtype(dtype).itemsize
    if O <= pack:
        TO = O                                   # full-dim block (allowed)
    else:
        TO = min(_MAX_TO, _round_up(O, pack))
    lane_cap = max(128, ((_TILE_BYTES // max(TO * itemsize, 1)) // 128) * 128)
    TR = min(_round_up(R, 128), lane_cap)
    return TO, TR, pack


def _split_rows_for_megacore(O, TO, pack):
    """Guarantee >=2 blocks along the 'parallel' row axis so both v7x TCs get work."""
    if (not _ASSUME_TWO_TC) or O <= pack or pl.cdiv(O, TO) >= 2:
        return TO
    return min(TO, _round_up(pl.cdiv(O, 2), pack))


# ------------------------------- Pallas kernels ------------------------------

def _fpgm_dist_kernel(w_ref, med_ref, dist_ref, acc_ref, *, n_chunks, rem_cols):
    # w_ref: (TO, TR)  med_ref: (1, TR)  dist_ref: (TO, 1) f32  acc_ref: (TO, 128) f32
    # dist[o] = || W[o, :] - median ||_2, accumulated across the R grid axis.
    r = pl.program_id(1)
    last = pl.num_programs(1) - 1

    @pl.when(r == 0)
    def _():
        acc_ref[...] = jnp.zeros_like(acc_ref)

    diff = w_ref[...].astype(jnp.float32) - med_ref[...].astype(jnp.float32)
    d2 = diff * diff

    def _accumulate(vals):
        # Collapse TR/128 lane chunks with pure VALU adds (lane-tile-aligned slices).
        acc = acc_ref[...]
        for c in range(n_chunks):
            acc = acc + vals[:, c * 128:(c + 1) * 128]
        acc_ref[...] = acc

    if rem_cols:
        # R is not a multiple of TR: tail lanes of the LAST R block are unspecified
        # boundary data and must be masked out (select, so NaN/Inf-safe).
        @pl.when(r != last)
        def _():
            _accumulate(d2)

        @pl.when(r == last)
        def _():
            col = jax.lax.broadcasted_iota(jnp.int32, d2.shape, 1)
            _accumulate(jnp.where(col < rem_cols, d2, 0.0))
    else:
        _accumulate(d2)

    @pl.when(r == last)
    def _():
        # single cross-lane (XLU) reduce + sqrt + (TO,1) store, once per row block
        dist_ref[...] = jnp.sqrt(jnp.sum(acc_ref[...], axis=-1, keepdims=True))


def _apply_mask_kernel(x_ref, mask_ref, o_ref):
    # x_ref: (TO, TR)  mask_ref: (TO, 1) or (TO, TR)  -> broadcast multiply on lanes
    o_ref[...] = x_ref[...] * mask_ref[...].astype(x_ref.dtype)


# ------------------------------- kernel wrappers ------------------------------

def fpgm_channel_distance(w2d, med_row):
    """w2d: (O, R) native dtype; med_row: (1, R) native dtype -> (O,) f32 distances."""
    O, R = w2d.shape
    TO, TR, pack = _tiles(O, R, w2d.dtype)
    TO = _split_rows_for_megacore(O, TO, pack)   # R axis is the reduction, can't shard

    grid_o = pl.cdiv(O, TO)
    grid_r = pl.cdiv(R, TR)
    rem_cols = R % TR            # valid lanes in the final R block (0 => full block)
    n_chunks = TR // 128

    kernel = functools.partial(_fpgm_dist_kernel, n_chunks=n_chunks, rem_cols=rem_cols)

    dist = pl.pallas_call(
        kernel,
        out_shape=jax.ShapeDtypeStruct((O, 1), jnp.float32),
        grid_spec=pltpu.PrefetchScalarGridSpec(
            num_scalar_prefetch=0,
            grid=(grid_o, grid_r),
            in_specs=[pl.BlockSpec((TO, TR), lambda i, r: (i, r)),
                      pl.BlockSpec((1, TR), lambda i, r: (0, r))],
            out_specs=pl.BlockSpec((TO, 1), lambda i, r: (i, 0)),
            scratch_shapes=[pltpu.VMEM((TO, 128), jnp.float32)]),
        compiler_params=pltpu.CompilerParams(
            dimension_semantics=("parallel", "arbitrary"),
            vmem_limit_bytes=_VMEM_LIMIT),
    )(w2d, med_row)
    return dist[:, 0]


def apply_mask(x2d, mask2d):
    """x2d: (O, R); mask2d: (O, 1) per-channel or (O, R) unstructured (same dtype as x)."""
    O, R = x2d.shape
    per_channel = (mask2d.shape[1] == 1) and (R != 1)
    TO, TR, pack = _tiles(O, R, x2d.dtype)
    if pl.cdiv(O, TO) * pl.cdiv(R, TR) < 2:
        TO = _split_rows_for_megacore(O, TO, pack)

    grid_o = pl.cdiv(O, TO)
    grid_r = pl.cdiv(R, TR)

    if per_channel:
        mask_spec = pl.BlockSpec((TO, 1), lambda i, r: (i, 0))
    else:
        mask_spec = pl.BlockSpec((TO, TR), lambda i, r: (i, r))

    # Boundary blocks are safe here: out-of-range lanes/rows are never written back.
    return pl.pallas_call(
        _apply_mask_kernel,
        out_shape=jax.ShapeDtypeStruct((O, R), x2d.dtype),
        grid_spec=pltpu.PrefetchScalarGridSpec(
            num_scalar_prefetch=0,
            grid=(grid_o, grid_r),
            in_specs=[pl.BlockSpec((TO, TR), lambda i, r: (i, r)), mask_spec],
            out_specs=pl.BlockSpec((TO, TR), lambda i, r: (i, r))),
        compiler_params=pltpu.CompilerParams(
            dimension_semantics=("parallel", "parallel"),
            vmem_limit_bytes=_VMEM_LIMIT),
    )(x2d, mask2d)


# --------------------------- module re-implementation ------------------------

class IncrementalPruningParametrization:
    """JAX/Pallas re-implementation of the PyTorch parametrization.

    The mask is built once in __init__ (FPGM channel-distance reduction runs in a
    Pallas kernel); forward() is the masked multiply, also a Pallas kernel.
    """

    def __init__(self, net_weight, channel_pruning=False, pruning_ratio=0.6,
                 n2m_pruning=False, init_train_ep=5, binary_mask=False, tao=1e-4,
                 epoch_count=0, total_epochs=0, m=None):
        self.channel_pruning = channel_pruning
        self.pruning_ratio = pruning_ratio
        self.n2m_pruning = n2m_pruning
        self.init_train_ep = init_train_ep
        self.binary_mask = binary_mask
        self.tao = tao
        self.epoch_count = epoch_count
        self.total_epochs = total_epochs
        self.m = m
        self.fpgm_weights = True

        net_weight = jax.lax.stop_gradient(net_weight)
        is_depthwise = net_weight.shape[1] == 1 if net_weight.ndim >= 2 else False

        if int(self.pruning_ratio * net_weight.size) == 0 or net_weight.shape[0] <= 32:
            if channel_pruning:
                mask = jnp.ones((net_weight.shape[0],), jnp.float32)
            else:
                mask = jnp.ones_like(net_weight)
        elif is_depthwise and (not channel_pruning):
            mask = jnp.ones_like(net_weight)
        else:
            mask = self.create_mask(net_weight)
        self.mask = mask

    def create_mask(self, net_weight):
        if self.epoch_count <= self.init_train_ep:
            if self.channel_pruning:
                return jnp.ones((net_weight.shape[0],), jnp.float32)
            return jnp.ones_like(net_weight)

        total_epochs_knee_point = (self.total_epochs - self.init_train_ep) * 2 // 3
        alpha_factor = 0.0

        # TODO(synk): n2m (N:M) blockwise top-k pruning path not implemented
        # (per-block topk has no clean Pallas equivalent).
        if self.channel_pruning and self.fpgm_weights:
            O = net_weight.shape[0]
            w2d = net_weight.reshape(O, -1)         # native dtype -> half HBM for bf16
            # torch.median(dim=0) returns the LOWER median; sort along the last axis of
            # the transpose (avoids a transpose-heavy axis-0 sort inside XLA).
            med = jnp.sort(w2d.T, axis=-1)[:, (O - 1) // 2]
            # FPGM distance reduction on TPU (Pallas kernel), accumulates in f32.
            dist = fpgm_channel_distance(w2d, med.reshape(1, -1))
            weight_abs = jnp.abs(dist)              # (O,) f32
        else:
            weight_abs = jnp.abs(net_weight.astype(jnp.float32))

        prune_elements = self.pruning_ratio * (self.epoch_count - self.init_train_ep) / (
            total_epochs_knee_point - self.init_train_ep)
        n = weight_abs.size
        keep_elem_k = int((1 - prune_elements) * n)
        keep_elem_k = max(1, min(keep_elem_k, n - 1))   # guard late-epoch edge cases

        # Threshold t = midpoint of k-th and (k+1)-th largest |value| (torch.topk
        # semantics).  A single ascending sort replaces the two huge-k top_k calls.
        # TODO(synk): threshold selection runs in plain JAX/XLA (no Pallas sort/topk).
        s = jnp.sort(weight_abs.reshape(-1))
        t = (s[n - keep_elem_k] + s[n - keep_elem_k - 1]) / 2.0

        soft_mask = jnp.where(weight_abs >= t, 1.0, alpha_factor)
        if self.channel_pruning:
            return soft_mask.astype(jnp.float32)        # (O,)
        return soft_mask.astype(net_weight.dtype)       # full-tensor mask, narrow dtype

    def forward(self, X):
        if self.channel_pruning:
            mask = self.mask.astype(X.dtype)
            if X.ndim == 4:
                # TODO(synk): for R = I*H*W < 128 a transposed lane-dense layout would
                # avoid masked stores; not worth the extra transpose passes for now.
                O = X.shape[0]
                y = apply_mask(X.reshape(O, -1), mask.reshape(O, 1))
                return y.reshape(X.shape)
            elif X.ndim == 1:
                # lane-dense layout: channels on the lane axis -> full-width stores
                y = apply_mask(X.reshape(1, -1), mask.reshape(1, -1))
                return y.reshape(X.shape)
            else:
                raise ValueError("channel pruning expects 1D or 4D input")
        else:
            O = X.shape[0]
            y = apply_mask(X.reshape(O, -1), self.mask.astype(X.dtype).reshape(O, -1))
            return y.reshape(X.shape)

    def right_inverse(self, A):
        return A


# ----------------------------------- main ------------------------------------

if __name__ == "__main__":
    key = jax.random.PRNGKey(0)
    k1, k2, k3, k4 = jax.random.split(key, 4)

    init_ep, ep, total = 5, 12, 30
    knee = (total - init_ep) * 2 // 3
    prune_elements = 0.6 * (ep - init_ep) / (knee - init_ep)

    # --- channel (FPGM) pruning, conv OIHW with R=36 < 128 (tests boundary/tail mask)
    O, I, H, W = 64, 4, 3, 3
    weight = jax.random.normal(k1, (O, I, H, W), dtype=jnp.float32)
    bias = jax.random.normal(k2, (O,), dtype=jnp.float32)

    param = IncrementalPruningParametrization(
        weight, channel_pruning=True, pruning_ratio=0.6,
        init_train_ep=init_ep, epoch_count=ep, total_epochs=total)

    out_w = jax.block_until_ready(param.forward(weight))
    out_b = jax.block_until_ready(param.forward(bias))

    # pure-JAX reference (mirrors PyTorch semantics)
    def ref_channel_mask(w):
        o = w.shape[0]
        w2d = w.reshape(o, -1)
        med = jnp.sort(w2d, axis=0)[(o - 1) // 2]
        dist = jnp.sqrt(jnp.sum((w2d - med[None, :]) ** 2, axis=-1))
        kk = int((1 - prune_elements) * dist.size)
        s = jnp.sort(dist)[::-1]
        t = (s[kk - 1] + s[kk]) / 2.0
        return (dist >= t).astype(jnp.float32)

    ref_mask = ref_channel_mask(weight)
    ref_w = weight * ref_mask[:, None, None, None]
    ref_b = bias * ref_mask

    assert out_w.shape == weight.shape and out_w.dtype == weight.dtype
    assert jnp.allclose(out_w, ref_w, atol=1e-5, rtol=1e-5)
    assert jnp.allclose(out_b, ref_b, atol=1e-5, rtol=1e-5)
    assert jnp.allclose(param.mask, ref_mask)

    # --- channel pruning, conv with R=128 exactly (no tail-mask path)
    O2, I2, H2, W2 = 48, 2, 8, 8
    weight2 = jax.random.normal(k4, (O2, I2, H2, W2), dtype=jnp.float32)
    param2 = IncrementalPruningParametrization(
        weight2, channel_pruning=True, pruning_ratio=0.6,
        init_train_ep=init_ep, epoch_count=ep, total_epochs=total)
    out_w2 = jax.block_until_ready(param2.forward(weight2))
    ref_mask2 = ref_channel_mask(weight2)
    assert jnp.allclose(out_w2, weight2 * ref_mask2[:, None, None, None], atol=1e-5, rtol=1e-5)

    # --- unstructured pruning on a small linear weight (full-tensor mask path)
    lw = jax.random.normal(k3, (64, 48), dtype=jnp.float32)
    param_u = IncrementalPruningParametrization(
        lw, channel_pruning=False, pruning_ratio=0.6,
        init_train_ep=init_ep, epoch_count=ep, total_epochs=total)
    out_u = jax.block_until_ready(param_u.forward(lw))

    wa = jnp.abs(lw)
    ku = int((1 - prune_elements) * wa.size)
    su = jnp.sort(wa.reshape(-1))[::-1]
    tu = (su[ku - 1] + su[ku]) / 2.0
    ref_u = lw * (wa >= tu).astype(lw.dtype)
    assert out_u.shape == lw.shape and out_u.dtype == lw.dtype
    assert jnp.allclose(out_u, ref_u, atol=1e-5, rtol=1e-5)

    print("KERNEL_OK")
</pallas_src>

<mosaic_0001>
module attributes {stable_mosaic.version = 11 : i64} {
  func.func @_fpgm_dist_kernel(%arg0: i32, %arg1: i32, %arg2: memref<32x128xf32, #tpu.memory_space<vmem>>, %arg3: memref<1x128xf32, #tpu.memory_space<vmem>>, %arg4: memref<32x1xf32, #tpu.memory_space<vmem>>, %arg5: memref<32x128xf32, #tpu.memory_space<vmem>>) attributes {dimension_semantics = [#tpu.dimension_semantics<parallel>, #tpu.dimension_semantics<arbitrary>], iteration_bounds = array<i64: 2, 1>, scalar_prefetch = 0 : i64, scratch_operands = 1 : i64, tpu.core_type = #tpu.core_type<tc>, window_params = [{transform_indices = @transform_0, window_bounds = array<i64: 32, 128>}, {transform_indices = @transform_1, window_bounds = array<i64: 1, 128>}, {transform_indices = @transform_2, window_bounds = array<i64: 32, 1>}]} {
    %c0_i32 = arith.constant 0 : i32
    %0 = arith.cmpi eq, %arg1, %c0_i32 : i32
    %1 = arith.extui %0 : i1 to i32
    %c0_i32_0 = arith.constant 0 : i32
    %2 = arith.cmpi ne, %1, %c0_i32_0 : i32
    scf.if %2 {
      %cst = arith.constant 0.000000e+00 : f32
      %17 = vector.broadcast %cst : f32 to vector<32x128xf32>
      %c0_10 = arith.constant 0 : index
      %c0_11 = arith.constant 0 : index
      %18 = vector.load %arg5[%c0_10, %c0_11] : memref<32x128xf32, #tpu.memory_space<vmem>>, vector<32x128xf32>
      tpu.vector_store %arg5[%c0_10, %c0_11], %17 {strides = array<i32>} : memref<32x128xf32, #tpu.memory_space<vmem>>, vector<32x128xf32>,
    } else {
    }
    %c0 = arith.constant 0 : index
    %c0_1 = arith.constant 0 : index
    %3 = vector.load %arg2[%c0, %c0_1] : memref<32x128xf32, #tpu.memory_space<vmem>>, vector<32x128xf32>
    %c0_2 = arith.constant 0 : index
    %c0_3 = arith.constant 0 : index
    %4 = vector.load %arg3[%c0_2, %c0_3] : memref<1x128xf32, #tpu.memory_space<vmem>>, vector<1x128xf32>
    %5 = vector.broadcast %4 : vector<1x128xf32> to vector<32x128xf32>
    %6 = arith.subf %3, %5 : vector<32x128xf32>
    %7 = arith.mulf %6, %6 : vector<32x128xf32>
    %c0_i32_4 = arith.constant 0 : i32
    %8 = arith.cmpi ne, %arg1, %c0_i32_4 : i32
    %9 = arith.extui %8 : i1 to i32
    %c0_i32_5 = arith.constant 0 : i32
    %10 = arith.cmpi ne, %9, %c0_i32_5 : i32
    scf.if %10 {
      %c0_10 = arith.constant 0 : index
      %c0_11 = arith.constant 0 : index
      %17 = vector.load %arg5[%c0_10, %c0_11] : memref<32x128xf32, #tpu.memory_space<vmem>>, vector<32x128xf32>
      %18 = arith.addf %17, %7 : vector<32x128xf32>
      %c0_12 = arith.constant 0 : index
      %c0_13 = arith.constant 0 : index
      %19 = vector.load %arg5[%c0_12, %c0_13] : memref<32x128xf32, #tpu.memory_space<vmem>>, vector<32x128xf32>
      tpu.vector_store %arg5[%c0_12, %c0_13], %18 {strides = array<i32>} : memref<32x128xf32, #tpu.memory_space<vmem>>, vector<32x128xf32>,
    } else {
    }
    %c0_i32_6 = arith.constant 0 : i32
    %11 = arith.cmpi eq, %arg1, %c0_i32_6 : i32
    %12 = arith.extui %11 : i1 to i32
    %c0_i32_7 = arith.constant 0 : i32
    %13 = arith.cmpi ne, %12, %c0_i32_7 : i32
    scf.if %13 {
      %17 = tpu.iota {dimensions = array<i32: 1>} : vector<32x128xi32>
      %c36_i32 = arith.constant 36 : i32
      %18 = vector.broadcast %c36_i32 : i32 to vector<32x128xi32>
      %19 = arith.cmpi slt, %17, %18 : vector<32x128xi32>
      %cst = arith.constant 0.000000e+00 : f32
      %20 = vector.broadcast %cst : f32 to vector<32x128xf32>
      %21 = arith.select %19, %7, %20 : vector<32x128xi1>, vector<32x128xf32>
      %c0_10 = arith.constant 0 : index
      %c0_11 = arith.constant 0 : index
      %22 = vector.load %arg5[%c0_10, %c0_11] : memref<32x128xf32, #tpu.memory_space<vmem>>, vector<32x128xf32>
      %23 = arith.addf %22, %21 : vector<32x128xf32>
      %c0_12 = arith.constant 0 : index
      %c0_13 = arith.constant 0 : index
      %24 = vector.load %arg5[%c0_12, %c0_13] : memref<32x128xf32, #tpu.memory_space<vmem>>, vector<32x128xf32>
      tpu.vector_store %arg5[%c0_12, %c0_13], %23 {strides = array<i32>} : memref<32x128xf32, #tpu.memory_space<vmem>>, vector<32x128xf32>,
    } else {
    }
    %c0_i32_8 = arith.constant 0 : i32
    %14 = arith.cmpi eq, %arg1, %c0_i32_8 : i32
    %15 = arith.extui %14 : i1 to i32
    %c0_i32_9 = arith.constant 0 : i32
    %16 = arith.cmpi ne, %15, %c0_i32_9 : i32
    scf.if %16 {
      %c0_10 = arith.constant 0 : index
      %c0_11 = arith.constant 0 : index
      %17 = vector.load %arg5[%c0_10, %c0_11] : memref<32x128xf32, #tpu.memory_space<vmem>>, vector<32x128xf32>
      %cst = arith.constant dense<0.000000e+00> : vector<32xf32>
      %18 = vector.multi_reduction <add>, %17, %cst [1] : vector<32x128xf32> to vector<32xf32>
      %19 = vector.shape_cast %18 : vector<32xf32> to vector<32x1xf32>
      %20 = math.sqrt %19 : vector<32x1xf32>
      %c0_12 = arith.constant 0 : index
      %c0_13 = arith.constant 0 : index
      %21 = vector.load %arg4[%c0_12, %c0_13] : memref<32x1xf32, #tpu.memory_space<vmem>>, vector<32x1xf32>
      tpu.vector_store %arg4[%c0_12, %c0_13], %20 {strides = array<i32>} : memref<32x1xf32, #tpu.memory_space<vmem>>, vector<32x1xf32>,
    } else {
    }
    return
  }
  func.func @transform_0(%arg0: i32, %arg1: i32) -> (i32, i32) {
    %c0_i32 = arith.constant 0 : i32
    return %arg0, %arg1 : i32, i32
  }
  func.func @transform_1(%arg0: i32, %arg1: i32) -> (i32, i32) {
    %c0_i32 = arith.constant 0 : i32
    %c0_i32_0 = arith.constant 0 : i32
    return %c0_i32, %arg1 : i32, i32
  }
  func.func @transform_2(%arg0: i32, %arg1: i32) -> (i32, i32) {
    %c0_i32 = arith.constant 0 : i32
    %c0_i32_0 = arith.constant 0 : i32
    return %arg0, %c0_i32 : i32, i32
  }
}

</mosaic_0001>

<bundles_post_ra>
// kernel: tpu_custom_call.1
= control target key start
LH: loop header
LB: loop body
LE: loop exit
PB: predicated region body
PF: predicated region fallthrough
CT: control target
= control target key end

     0   :  { %s458_s9 = smov 0   ;;  %s460_s10 = smov 0   ;;  %s505_s0 = inlined_call_operand.vmem [shape: f32[64,36], index: 0, kind: input, shape index: {}]   ;;  %s506_s1 = inlined_call_operand.vmem [shape: f32[1,36], index: 1, kind: input, shape index: {}]   ;;  %s507_s2 = inlined_call_operand.vmem [shape: f32[64,1], index: 2, kind: output, shape index: {}]  }
   0x1   :  { %s462_s11 = smov 0  }
   0x2 LB: > { %s24_s12 = sadd.s32 1, %s437_s10  ;;  %p379_p0 = scmp.ge.s32.totalorder %s441_s11, 1  ;;  %s441_s11 = sphi %s462_s11, %s12_s11   ;;  %s437_s10 = sphi %s460_s10, %s509_s10   ;;  %s433_s9 = sphi %s458_s9, %s508_s9  }
   0x3   : > { %p26_p1 = scmp.ge.s32.totalorder %s24_s12, 2  ;;  %p138_p2 = scmp.lt.s32.totalorder %s441_s11, 3 }
   0x5   : > { %s511_s12 = smov (%p26_p1, %s24_s12), 0  ;;  %p139_p3 = pnand %p379_p0, %p138_p2 }
   0x6   : > { %s380_s13 = sshll.u32 (!%p139_p3), %s433_s9, 2 }
   0x7   : > { %142 = sbr.rel (%p139_p3) target bundleno = 183 (0xb7), region = 28  ;;  %p167_p4 = scmp.lt.s32.totalorder (!%p139_p3), %s380_s13, 7 }
   0xc   : > { %v230_v0 = vlaneseq  ;;  %s513_s13 = smov (!%p167_p4, %s380_s13), 7  ;;  %v384_v1 = vld [vmem:[%s506_s1] ss:$0 sm:$0xff]  ;;  %vm289_vm1 = vcmask 7168  }
   0xd   : > { %s381_s14 = sshll.u32 %s513_s13, 3 }
   0xe   : > { %v231_v2 = vand.u32 127, %v230_v0  ;;  %s173_s19 = scalar_lea.vmem %s505_s0, %s381_s14  ;;  %s182_s22 = scalar_lea.vmem %s507_s2, %s381_s14 }
   0xf   : > { %v194_v3 = vld [vmem:[%s173_s19 + $0x10] sm:$0xff]  ;;  %v192_v4 = vld [vmem:[%s173_s19] sm:$0xff]  ;;  %v195_v5 = vld [vmem:[%s173_s19 + $0x18] sm:$0xff] }
  0x10   : > { %v205_v6 = vsub.f32 %v194_v3, %v384_v1  ;;  %v203_v7 = vsub.f32 %v192_v4, %v384_v1  ;;  %v206_v8 = vsub.f32 %v195_v5, %v384_v1  ;;  %v193_v9 = vld [vmem:[%s173_s19 + $0x8] sm:$0xff]  ;;  %vm232_vm0 = vcmp.lt.s32.totalorder %v231_v2, 36 }
  0x11   : > { %v204_v10 = vsub.f32 %v193_v9, %v384_v1 }
  0x12   : > { %v209_v11 = vmul.f32 %v205_v6, %v205_v6  ;;  %v207_v12 = vmul.f32 %v203_v7, %v203_v7  ;;  %v210_v13 = vmul.f32 %v206_v8, %v206_v8 }
  0x13   : > { %v208_v14 = vmul.f32 %v204_v10, %v204_v10 }
  0x14   : > { %v235_v15 = vsel %vm232_vm0, %v209_v11, 0.0  ;;  %v233_v16 = vsel %vm232_vm0, %v207_v12, 0.0  ;;  %v236_v17 = vsel %vm232_vm0, %v210_v13, 0.0 }
  0x15   : > { %257 = vadd.xlane.f32.xlu1 %v235_v15  ;;  %253 = vadd.xlane.f32.xlu0 %v233_v16  ;;  %v234_v18 = vsel %vm232_vm0, %v208_v14, 0.0 }
  0x19   : > { %259 = vadd.xlane.f32.xlu1 %v236_v17  ;;  %255 = vadd.xlane.f32.xlu0 %v234_v18 }
  0x9e   : > { %v258_v19 = vpop.xlane.xlu1 %257  ;;  %v254_v20 = vpop.xlane.xlu0 %253 }
  0x9f   : > { %411 = vrsqrt.f32 %v258_v19  ;;  %vm263_vm2 = vcmp.eq.f32.partialorder %v254_v20, inf  ;;  %v266_v27 = vand.u32 2147483648, %v254_v20  ;;  %vm265_vm3 = vcmp.eq.f32.partialorder %v254_v20, 0.0 }
  0xa0   : > { %413 = vrsqrt.f32 %v254_v20  ;;  %vm277_vm4 = vcmp.eq.f32.partialorder %v258_v19, inf  ;;  %v280_v36 = vand.u32 2147483648, %v258_v19  ;;  %vm279_vm8 = vcmp.eq.f32.partialorder %v258_v19, 0.0 }
  0xa2   : > { %v260_v21 = vpop.xlane.xlu1 %259  ;;  %v256_v22 = vpop.xlane.xlu0 %255 }
  0xa3   : > { %415 = vrsqrt.f32 %v260_v21  ;;  %vm284_vm5 = vcmp.eq.f32.partialorder %v260_v21, inf  ;;  %vm270_vm6 = vcmp.eq.f32.partialorder %v256_v22, inf  ;;  %v273_v35 = vand.u32 2147483648, %v256_v22 }
  0xa4   : > { %417 = vrsqrt.f32 %v256_v22  ;;  %vm272_vm7 = vcmp.eq.f32.partialorder %v256_v22, 0.0  ;;  %v287_v39 = vand.u32 2147483648, %v260_v21  ;;  %vm286_vm9 = vcmp.eq.f32.partialorder %v260_v21, 0.0 }
  0xac   : > { %v412_v23 = vpop.eup %411 }
  0xad   : > { %v414_v24 = vpop.eup %413  ;;  %v276_v26 = vmul.f32 %v412_v23, %v258_v19 }
  0xae   : > { %v262_v25 = vmul.f32 %v414_v24, %v254_v20 }
  0xaf   : > { %v278_v34 = vsel %vm277_vm4, %v258_v19, %v276_v26 }
  0xb0   : > { %v416_v28 = vpop.eup %415  ;;  %v264_v29 = vsel %vm263_vm2, %v254_v20, %v262_v25  ;;  %v281_v41 = vsel %vm279_vm8, %v280_v36, %v278_v34 }
  0xb1   : > { %v418_v30 = vpop.eup %417  ;;  %v267_v31 = vsel %vm265_vm3, %v266_v27, %v264_v29  ;;  %v283_v32 = vmul.f32 %v416_v28, %v260_v21  ;;  %292 = vst.msk [vmem:[%s182_s22 + $0x10] sm:$0xff] %vm289_vm1, %v281_v41 }
  0xb2   : > { %290 = vst.msk [vmem:[%s182_s22] sm:$0xff] %vm289_vm1, %v267_v31  ;;  %v269_v33 = vmul.f32 %v418_v30, %v256_v22 }
  0xb3   : > { %v285_v37 = vsel %vm284_vm5, %v260_v21, %v283_v32 }
  0xb4   : > { %v271_v38 = vsel %vm270_vm6, %v256_v22, %v269_v33  ;;  %v288_v42 = vsel %vm286_vm9, %v287_v39, %v285_v37 }
  0xb5   : > { %v274_v40 = vsel %vm272_vm7, %v273_v35, %v271_v38  ;;  %293 = vst.msk [vmem:[%s182_s22 + $0x18] sm:$0xff] %vm289_vm1, %v288_v42 }
  0xb6   : > { %291 = vst.msk [vmem:[%s182_s22 + $0x8] sm:$0xff] %vm289_vm1, %v274_v40 }
  0xb7 PF: > { %s12_s11 = sadd.s32 1, %s441_s11   ;;  %s508_s9 = smov %s437_s10 }
  0xb8   : > { %p9_p5 = scmp.ge.s32.totalorder %s12_s11, 4   ;;  %s509_s10 = smov %s511_s12 }
  0xba   :  { %11 = sbr.rel (!%p9_p5) target bundleno = 2 (0x2), region = 73 }

</bundles_post_ra>
